<compile_context>
chip_gen: v7x
topology: tpu7x:2x2x1
jax: 0.10.0
libtpu: 0.0.40
codegen_flags: <defaults>
</compile_context>

<pallas_src>
import jax
import jax.numpy as jnp
from jax.experimental import pallas as pl
from jax.experimental.pallas import tpu as pltpu


HIDDEN = 100
HIDDEN_PAD = 128   # zero-padded hidden -> full vregs / clean K=128 MXU pass
OUT = 2


def _round_up(n, m):
    return ((n + m - 1) // m) * m


def _make_kernel(mxu_dtype):
    def mlp_kernel(x_ref, w1_ref, b1_ref, w2_ref, b2_ref, o_ref):
        x = x_ref[...]
        w1 = w1_ref[...]
        if mxu_dtype is not None:
            # bf16 MXU operands (f32 accumulation): halves vmatmul passes on v5e.
            x = x.astype(mxu_dtype)
            w1 = w1.astype(mxu_dtype)
        # fc1: (tb, F) @ (F, 128) + (1, 128) -> h (tb, 128), f32 accumulation on MXU.
        h = jnp.dot(x, w1, preferred_element_type=jnp.float32)
        h = h + b1_ref[...]
        # fc2: (tb, 128) @ (128, 2) + (1, 2) -> (tb, 2). MXU-natural contraction
        # (no XLU transpose of h); the tiny (tb, 2) output uses masked stores but
        # writes only 8 B/row to HBM.
        out = jnp.dot(h, w2_ref[...], preferred_element_type=jnp.float32)
        out = out + b2_ref[...]
        o_ref[...] = out.astype(o_ref.dtype)
    return mlp_kernel


def _vmem_budget_bytes():
    """Per-generation scoped-VMEM budget: half of physical, capped at 64 MiB.
    v5e/v6e (128 MiB physical) -> 64 MiB; v7x (64 MiB per TC) -> 32 MiB."""
    phys = None
    try:
        phys = getattr(pltpu.get_tpu_info(), "vmem_capacity_bytes", None)
    except Exception:
        phys = None
    if not phys:
        phys = 64 * 1024 * 1024  # conservative fallback (v7x per-TC)
    return int(min(phys // 2, 64 * 1024 * 1024))


def _pick_tile_b(B, F, budget_bytes, itemsize=4):
    """Largest batch tile whose real VMEM footprint fits the budget.

    Accounts for lane padding to 128 of every VMEM tile, the h temporary, the
    double-buffered x and output tiles, and the resident (double-buffered) weights.
    """
    f_pad = _round_up(F, 128)
    # Fixed / resident allocations (conservatively assume double-buffering) + slack.
    fixed = 2 * _round_up(F, 8) * 128 * itemsize       # w1 (F, 128)
    fixed += 2 * 128 * 128 * itemsize                  # w2 (128, 2) lane-padded
    fixed += 4 * 8 * 128 * itemsize                    # b1 / b2 (sublane/lane padded)
    fixed += 2 * 1024 * 1024                           # compiler scratch / pipeline slack
    per_row = (2 * f_pad * itemsize    # double-buffered x tile (lanes padded to 128)
               + 2 * 128 * 4           # h + one f32 temporary
               + 2 * 128 * 4)          # double-buffered out tile (2 -> 128 lanes in VMEM)
    avail = max(budget_bytes - fixed, 128 * per_row)
    tb = max((avail // per_row) // 128 * 128, 128)

    b8 = _round_up(B, 8)
    if b8 <= tb:
        # Whole batch fits in one tile. For large batches still split into >=2 grid
        # steps so dimension_semantics=("parallel",) can feed both v7x TensorCores.
        if b8 >= 4096:
            return min(tb, _round_up(pl.cdiv(b8, 2), 128))
        return b8
    return tb


def nn_forward(x, w1, b1, w2, b2, *, tile_b=None, mxu_dtype=None):
    """Fused 2-layer MLP: (x @ w1 + b1) @ w2 + b2.

    x: (B, F); w1: (F, 128) (hidden zero-padded 100->128); b1: (1, 128);
    w2: (128, 2) (padded rows are zero); b2: (1, 2).
    Returns (B, 2), identical to fc2(fc1(x)) of the PyTorch module.
    """
    B, F = x.shape
    H = w1.shape[1]
    O = w2.shape[1]

    budget = _vmem_budget_bytes()
    tb = tile_b if tile_b is not None else _pick_tile_b(B, F, budget, x.dtype.itemsize)
    grid = (pl.cdiv(B, tb),)  # ragged last block is masked by Pallas (no jnp.pad copy)

    return pl.pallas_call(
        _make_kernel(mxu_dtype),
        out_shape=jax.ShapeDtypeStruct((B, O), x.dtype),
        grid=grid,
        in_specs=[
            pl.BlockSpec((tb, F), lambda i: (i, 0)),   # streamed x tiles
            pl.BlockSpec((F, H), lambda i: (0, 0)),    # resident weights / biases
            pl.BlockSpec((1, H), lambda i: (0, 0)),
            pl.BlockSpec((H, O), lambda i: (0, 0)),
            pl.BlockSpec((1, O), lambda i: (0, 0)),
        ],
        out_specs=pl.BlockSpec((tb, O), lambda i: (i, 0)),
        compiler_params=pltpu.CompilerParams(
            dimension_semantics=("parallel",),   # megacore sharding on v7x
            vmem_limit_bytes=budget,
        ),
    )(x, w1, b1, w2, b2)


def init_params(key, features, hidden=HIDDEN, out=OUT, hidden_pad=HIDDEN_PAD,
                dtype=jnp.float32):
    """PyTorch nn.Linear-style init; hidden dim zero-padded to 128 (math unchanged)."""
    k1, k2, k3, k4 = jax.random.split(key, 4)
    bound1 = 1.0 / (features ** 0.5)
    bound2 = 1.0 / (hidden ** 0.5)
    w1 = jax.random.uniform(k1, (features, hidden), dtype, -bound1, bound1)  # (in, hid)
    b1 = jax.random.uniform(k2, (1, hidden), dtype, -bound1, bound1)
    w2 = jax.random.uniform(k3, (hidden, out), dtype, -bound2, bound2)       # (hid, out)
    b2 = jax.random.uniform(k4, (1, out), dtype, -bound2, bound2)
    pad = hidden_pad - hidden
    w1 = jnp.pad(w1, ((0, 0), (0, pad)))   # zero cols -> padded h lanes are 0
    b1 = jnp.pad(b1, ((0, 0), (0, pad)))
    w2 = jnp.pad(w2, ((0, pad), (0, 0)))   # zero rows -> padding contributes 0
    return w1, b1, w2, b2


if __name__ == "__main__":
    key = jax.random.PRNGKey(0)
    kx, kx2, kp = jax.random.split(key, 3)

    features = 32
    w1, b1, w2, b2 = init_params(kp, features)

    # Aligned small batch (f32 path matches the PyTorch reference numerics).
    x = jax.random.normal(kx, (8, features), jnp.float32)
    out = jax.block_until_ready(nn_forward(x, w1, b1, w2, b2))
    ref = (x @ w1 + b1) @ w2 + b2
    assert out.shape == (8, OUT)
    assert jnp.allclose(out, ref, atol=1e-4, rtol=1e-4)

    # Unaligned batch exercises the ragged (masked) last block -- no jnp.pad copy.
    x2 = jax.random.normal(kx2, (13, features), jnp.float32)
    out2 = jax.block_until_ready(nn_forward(x2, w1, b1, w2, b2))
    ref2 = (x2 @ w1 + b1) @ w2 + b2
    assert out2.shape == (13, OUT)
    assert jnp.allclose(out2, ref2, atol=1e-4, rtol=1e-4)

    # Optional bf16 MXU-operand path (v5e optimization); looser tolerance vs f32 ref.
    out_bf = jax.block_until_ready(nn_forward(x, w1, b1, w2, b2, mxu_dtype=jnp.bfloat16))
    assert jnp.allclose(out_bf, ref, atol=5e-2, rtol=5e-2)

    print("KERNEL_OK")
</pallas_src>

<mosaic_0001>
module attributes {stable_mosaic.version = 11 : i64} {
  func.func @mlp_kernel(%arg0: i32, %arg1: memref<8x32xf32, #tpu.memory_space<vmem>>, %arg2: memref<32x128xf32, #tpu.memory_space<vmem>>, %arg3: memref<1x128xf32, #tpu.memory_space<vmem>>, %arg4: memref<128x2xf32, #tpu.memory_space<vmem>>, %arg5: memref<1x2xf32, #tpu.memory_space<vmem>>, %arg6: memref<8x2xf32, #tpu.memory_space<vmem>>) attributes {dimension_semantics = [#tpu.dimension_semantics<parallel>], iteration_bounds = array<i64: 1>, scalar_prefetch = 0 : i64, scratch_operands = 0 : i64, tpu.core_type = #tpu.core_type<tc>, window_params = [{transform_indices = @transform_0, window_bounds = array<i64: 8, 32>}, {pipeline_mode = #tpu.pipeline_mode<synchronous>, transform_indices = @transform_1, window_bounds = array<i64: 32, 128>}, {pipeline_mode = #tpu.pipeline_mode<synchronous>, transform_indices = @transform_2, window_bounds = array<i64: 1, 128>}, {pipeline_mode = #tpu.pipeline_mode<synchronous>, transform_indices = @transform_3, window_bounds = array<i64: 128, 2>}, {pipeline_mode = #tpu.pipeline_mode<synchronous>, transform_indices = @transform_4, window_bounds = array<i64: 1, 2>}, {transform_indices = @transform_5, window_bounds = array<i64: 8, 2>}]} {
    %c0 = arith.constant 0 : index
    %c0_0 = arith.constant 0 : index
    %0 = vector.load %arg1[%c0, %c0_0] : memref<8x32xf32, #tpu.memory_space<vmem>>, vector<8x32xf32>
    %c0_1 = arith.constant 0 : index
    %c0_2 = arith.constant 0 : index
    %1 = vector.load %arg2[%c0_1, %c0_2] : memref<32x128xf32, #tpu.memory_space<vmem>>, vector<32x128xf32>
    %cst = arith.constant dense<0.000000e+00> : vector<8x128xf32>
    %2 = tpu.matmul %0, %1, %cst {dimension_numbers = #tpu.dot_dimension_numbers<[1], [0], [0], [1], [0, 0, 1, 1], [], []>} : vector<8x32xf32>, vector<32x128xf32>, vector<8x128xf32> -> vector<8x128xf32>
    %c0_3 = arith.constant 0 : index
    %c0_4 = arith.constant 0 : index
    %3 = vector.load %arg3[%c0_3, %c0_4] : memref<1x128xf32, #tpu.memory_space<vmem>>, vector<1x128xf32>
    %4 = vector.broadcast %3 : vector<1x128xf32> to vector<8x128xf32>
    %5 = arith.addf %2, %4 : vector<8x128xf32>
    %c0_5 = arith.constant 0 : index
    %c0_6 = arith.constant 0 : index
    %6 = vector.load %arg4[%c0_5, %c0_6] : memref<128x2xf32, #tpu.memory_space<vmem>>, vector<128x2xf32>
    %cst_7 = arith.constant dense<0.000000e+00> : vector<8x2xf32>
    %7 = tpu.matmul %5, %6, %cst_7 {dimension_numbers = #tpu.dot_dimension_numbers<[1], [0], [0], [1], [0, 0, 1, 1], [], []>} : vector<8x128xf32>, vector<128x2xf32>, vector<8x2xf32> -> vector<8x2xf32>
    %c0_8 = arith.constant 0 : index
    %c0_9 = arith.constant 0 : index
    %8 = vector.load %arg5[%c0_8, %c0_9] : memref<1x2xf32, #tpu.memory_space<vmem>>, vector<1x2xf32>
    %9 = vector.broadcast %8 : vector<1x2xf32> to vector<8x2xf32>
    %10 = arith.addf %7, %9 : vector<8x2xf32>
    %c0_10 = arith.constant 0 : index
    %c0_11 = arith.constant 0 : index
    %11 = vector.load %arg6[%c0_10, %c0_11] : memref<8x2xf32, #tpu.memory_space<vmem>>, vector<8x2xf32>
    tpu.vector_store %arg6[%c0_10, %c0_11], %10 {strides = array<i32>} : memref<8x2xf32, #tpu.memory_space<vmem>>, vector<8x2xf32>,
    return
  }
  func.func @transform_0(%arg0: i32) -> (i32, i32) {
    %c0_i32 = arith.constant 0 : i32
    %c0_i32_0 = arith.constant 0 : i32
    return %arg0, %c0_i32 : i32, i32
  }
  func.func @transform_1(%arg0: i32) -> (i32, i32) {
    %c0_i32 = arith.constant 0 : i32
    %c0_i32_0 = arith.constant 0 : i32
    %c0_i32_1 = arith.constant 0 : i32
    return %c0_i32, %c0_i32_0 : i32, i32
  }
  func.func @transform_2(%arg0: i32) -> (i32, i32) {
    %c0_i32 = arith.constant 0 : i32
    %c0_i32_0 = arith.constant 0 : i32
    %c0_i32_1 = arith.constant 0 : i32
    return %c0_i32, %c0_i32_0 : i32, i32
  }
  func.func @transform_3(%arg0: i32) -> (i32, i32) {
    %c0_i32 = arith.constant 0 : i32
    %c0_i32_0 = arith.constant 0 : i32
    %c0_i32_1 = arith.constant 0 : i32
    return %c0_i32, %c0_i32_0 : i32, i32
  }
  func.func @transform_4(%arg0: i32) -> (i32, i32) {
    %c0_i32 = arith.constant 0 : i32
    %c0_i32_0 = arith.constant 0 : i32
    %c0_i32_1 = arith.constant 0 : i32
    return %c0_i32, %c0_i32_0 : i32, i32
  }
  func.func @transform_5(%arg0: i32) -> (i32, i32) {
    %c0_i32 = arith.constant 0 : i32
    %c0_i32_0 = arith.constant 0 : i32
    return %arg0, %c0_i32 : i32, i32
  }
}

</mosaic_0001>

<bundles_post_ra>
// kernel: tpu_custom_call.1
= control target key start
LH: loop header
LB: loop body
LE: loop exit
PB: predicated region body
PF: predicated region fallthrough
CT: control target
= control target key end

     0   :  { %v309_v0 = vmov 0.0|0.0   ;;  %vm310_vm0 = vmmov 0   ;;  %v311_v4 = vmov 0.0   ;;  %vm32_vm1 = vcmask 261120   ;;  %s414_s1 = inlined_call_operand.vmem [shape: f32[32,128], index: 1, kind: input, shape index: {}]   ;;  %s415_s3 = inlined_call_operand.vmem [shape: f32[128,2], index: 3, kind: input, shape index: {}]   ;;  %s416_s0 = inlined_call_operand.vmem [shape: f32[8,32], index: 0, kind: input, shape index: {}]   ;;  %s417_s2 = inlined_call_operand.vmem [shape: f32[1,128], index: 2, kind: input, shape index: {}]   ;;  %s418_s4 = inlined_call_operand.vmem [shape: f32[1,2], index: 4, kind: input, shape index: {}]   ;;  %s419_s5 = inlined_call_operand.vmem [shape: f32[8,2], index: 5, kind: output, shape index: {}]  }
   0x1   :  { %276 = vmatprep.subr.bf16.mxu0 %v309_v0  ;;  %v21_v1 = vld [vmem:[%s414_s1] sm:$0xff]  ;;  %v22_v2 = vld [vmem:[%s414_s1 + $0x8] sm:$0xff]  ;;  %v23_v3 = vld [vmem:[%s414_s1 + $0x10] sm:$0xff]  ;;  %238 = vmatprep.mubr.msk.f32.mxu0 %vm310_vm0, %v311_v4  ;;  %vm199_vm2 = vcmask 15360  }
   0x2   :  { %v277_v5 = vpack.c.bf16 %v22_v2, %v21_v1  ;;  %v24_v6 = vld [vmem:[%s414_s1 + $0x18] sm:$0xff]  ;;  %282 = vmatprep.subr.bf16.mxu1 %v309_v0  ;;  %v106_v7 = vld [vmem:[%s415_s3] sm:$0xff]  ;;  %273 = vmatprep.mubr.msk.f32.mxu1 %vm310_vm0, %v311_v4  ;;  %v107_v8 = vld [vmem:[%s415_s3 + $0x8] sm:$0xff] }
   0x3   :  { %v108_v9 = vld [vmem:[%s415_s3 + $0x10] sm:$0xff]  ;;  %v109_v10 = vld [vmem:[%s415_s3 + $0x18] sm:$0xff]  ;;  %v280_v11 = vpack.c.bf16 %v24_v6, %v23_v3  ;;  %v283_v12 = vpack.c.bf16 %v107_v8, %v106_v7  ;;  %v110_v14 = vld [vmem:[%s415_s3 + $0x20] sm:$0xff] }
   0x4   :  { %278 = vmatpush3.bf16.msra.mxu0 %v277_v5  ;;  %v286_v13 = vpack.c.bf16 %v109_v10, %v108_v9  ;;  %v111_v15 = vld [vmem:[%s415_s3 + $0x28] sm:$0xff]  ;;  %v20_v16 = vld [vmem:[%s416_s0] sm:$0xff]  ;;  %v112_v18 = vld [vmem:[%s415_s3 + $0x30] sm:$0xff] }
   0x5   :  { %279 = vmatprep.subr.bf16.mxu0 %v309_v0  ;;  %284 = vmatpush3.bf16.msra.mxu1 %v283_v12  ;;  %v289_v17 = vpack.c.bf16 %v111_v15, %v110_v14  ;;  %v113_v19 = vld [vmem:[%s415_s3 + $0x38] sm:$0xff]  ;;  %v114_v21 = vld [vmem:[%s415_s3 + $0x40] sm:$0xff]  ;;  %v115_v22 = vld [vmem:[%s415_s3 + $0x48] sm:$0xff] }
   0x6   :  { %285 = vmatprep.subr.bf16.mxu1 %v309_v0  ;;  %v292_v20 = vpack.c.bf16 %v113_v19, %v112_v18  ;;  %v295_v23 = vpack.c.bf16 %v115_v22, %v114_v21  ;;  %v116_v24 = vld [vmem:[%s415_s3 + $0x50] sm:$0xff]  ;;  %v117_v25 = vld [vmem:[%s415_s3 + $0x58] sm:$0xff]  ;;  %v118_v27 = vld [vmem:[%s415_s3 + $0x60] sm:$0xff] }
   0x7   :  { %v298_v26 = vpack.c.bf16 %v117_v25, %v116_v24  ;;  %v119_v28 = vld [vmem:[%s415_s3 + $0x68] sm:$0xff]  ;;  %v120_v30 = vld [vmem:[%s415_s3 + $0x70] sm:$0xff]  ;;  %v121_v31 = vld [vmem:[%s415_s3 + $0x78] sm:$0xff] }
   0x8   :  { %281 = vmatpush3.bf16.msra.mxu0 %v280_v11  ;;  %v301_v29 = vpack.c.bf16 %v119_v28, %v118_v27  ;;  %v304_v32 = vpack.c.bf16 %v121_v31, %v120_v30  ;;  %v205_v33 = vld [vmem:[%s417_s2] ss:$0 sm:$0xff] }
   0x9   :  { %287 = vmatpush3.bf16.msra.mxu1 %v286_v13  ;;  %v207_v37 = vld [vmem:[%s418_s4] ss:$0 sm:$0xff] }
   0xa   :  { %288 = vmatprep.subr.bf16.mxu1 %v309_v0 }
   0xb   :  { %239 = vmatmul.mubr.msk.f32.vlgmr.msra.gmra.mrb[0].mxu0 %vm32_vm1, %v20_v16 }
   0xd   :  { %290 = vmatpush3.bf16.msra.mxu1 %v289_v17 }
   0xe   :  { %291 = vmatprep.subr.bf16.mxu1 %v309_v0 }
  0x11   :  { %293 = vmatpush3.bf16.msra.mxu1 %v292_v20 }
  0x12   :  { %294 = vmatprep.subr.bf16.mxu1 %v309_v0 }
  0x15   :  { %296 = vmatpush3.bf16.msra.mxu1 %v295_v23 }
  0x16   :  { %297 = vmatprep.subr.bf16.mxu1 %v309_v0 }
  0x19   :  { %299 = vmatpush3.bf16.msra.mxu1 %v298_v26 }
  0x1a   :  { %300 = vmatprep.subr.bf16.mxu1 %v309_v0 }
  0x1d   :  { %302 = vmatpush3.bf16.msra.mxu1 %v301_v29 }
  0x1e   :  { %303 = vmatprep.subr.bf16.mxu1 %v309_v0 }
  0x21   :  { %305 = vmatpush3.bf16.msra.mxu1 %v304_v32 }
  0xde   :  { %v102_v34 = vpop.f32.mrb[0].mxu0 }
  0xdf   :  { %v103_v35 = vadd.f32 %v205_v33, %v102_v34  ;;  %v240_v36 = vpop.f32.mrb[1].mxu0 }
  0xe1   :  { %274 = vmatmul.mubr.f32.vlgmr.msra.gmra.mrb[0].mxu1 %v103_v35 }
 0x1b4   :  { %v195_v38 = vpop.f32.mrb[0].mxu1 }
 0x1b5   :  { %v196_v39 = vadd.f32 %v207_v37, %v195_v38  ;;  %v275_v40 = vpop.f32.mrb[1].mxu1 }
 0x1b7   :  { %200 = vst.msk [vmem:[%s419_s5] sm:$0xff] %vm199_vm2, %v196_v39 }

</bundles_post_ra>
